<compile_context>
chip_gen: v7x
topology: tpu7x:2x2x1
jax: 0.10.0
libtpu: 0.0.40
codegen_flags: <defaults>
</compile_context>

<pallas_src>
import math
import functools

import jax
import jax.numpy as jnp
import numpy as np
from jax import lax
from jax.experimental import pallas as pl
from jax.experimental.pallas import tpu as pltpu


def _attn_kernel(x_ref, wqkv_ref, bqkv_ref, wp_ref, bp_ref, o_ref,
                 *, n_head: int, head_dim: int, band_width: int, scale: float):
    # x_ref block: (1, T, C) bf16 -> one batch element per grid step.
    x = x_ref[0]                                     # (T, C) bf16
    T = x.shape[0]
    C = n_head * head_dim

    # Fused QKV projection: one wide MXU matmul, f32 accumulation, f32 bias add.
    qkv = jnp.dot(x, wqkv_ref[...],
                  preferred_element_type=jnp.float32) + bqkv_ref[...]       # (T, 3C) f32

    # Fold attention scale into q once (instead of scaling every (T,T) score tile).
    q = qkv[:, :C] * scale
    k = qkv[:, C:2 * C]
    v = qkv[:, 2 * C:]

    # Head-major (H, T, hd) operands for batched MXU passes over heads.
    qh = jnp.stack([q[:, h * head_dim:(h + 1) * head_dim]
                    for h in range(n_head)], axis=0).astype(jnp.bfloat16)
    kh = jnp.stack([k[:, h * head_dim:(h + 1) * head_dim]
                    for h in range(n_head)], axis=0).astype(jnp.bfloat16)
    vh = jnp.stack([v[:, h * head_dim:(h + 1) * head_dim]
                    for h in range(n_head)], axis=0).astype(jnp.bfloat16)

    # Scores (H, T, T): contract the last dims directly (no explicit k transpose).
    s = lax.dot_general(qh, kh, (((2,), (2,)), ((0,), (0,))),
                        preferred_element_type=jnp.float32)

    # Banded causal mask: position i may attend to j with  i - band_width <= j <= i.
    row = lax.broadcasted_iota(jnp.int32, (1, T, T), 1)
    col = lax.broadcasted_iota(jnp.int32, (1, T, T), 2)
    allowed = (col <= row) & (col >= row - band_width)
    s = jnp.where(allowed, s, -1e30)   # finite fill: NaN-safe even for fully-masked rows

    # Softmax in f32; the reciprocal goes to the EUP slot (VALU stays free).
    m = jnp.max(s, axis=-1, keepdims=True)
    p = jnp.exp(s - m)
    denom = jnp.sum(p, axis=-1, keepdims=True)
    p = p * pl.reciprocal(denom, approx=True)

    # y = att @ v, batched over heads: (H, T, hd), f32 accumulation.
    y = lax.dot_general(p.astype(jnp.bfloat16), vh, (((2,), (1,)), ((0,), (0,))),
                        preferred_element_type=jnp.float32)

    # Re-pack heads lane-dense (T, C) with a single concatenate, then one output
    # projection matmul and one dense store.
    y2d = jnp.concatenate([y[h] for h in range(n_head)], axis=-1)            # (T, C) f32

    out = jnp.dot(y2d.astype(jnp.bfloat16), wp_ref[...],
                  preferred_element_type=jnp.float32) + bp_ref[...]
    o_ref[0] = out.astype(o_ref.dtype)


def causal_self_attention(x, params, *, n_head: int, band_width: int):
    """x: [B, T, C] float32. params: wq/wk/wv/wp [C,C], bq/bk/bv/bp [1,C] (PyTorch Linear weight.T layout)."""
    B, T, C = x.shape
    assert C % n_head == 0
    head_dim = C // n_head
    scale = 1.0 / math.sqrt(head_dim)

    # Fuse QKV weights/biases once on the host side; bf16 weights feed the MXU,
    # f32 biases are added to the f32 accumulator.
    wqkv = jnp.concatenate([params["wq"], params["wk"], params["wv"]], axis=1).astype(jnp.bfloat16)
    bqkv = jnp.concatenate([params["bq"], params["bk"], params["bv"]], axis=1).astype(jnp.float32)
    wp = params["wp"].astype(jnp.bfloat16)
    bp = params["bp"].astype(jnp.float32)
    x_bf16 = x.astype(jnp.bfloat16)

    kernel = functools.partial(_attn_kernel, n_head=n_head, head_dim=head_dim,
                               band_width=band_width, scale=scale)

    x_spec = pl.BlockSpec((1, T, C), lambda b: (b, 0, 0))

    return pl.pallas_call(
        kernel,
        out_shape=jax.ShapeDtypeStruct((B, T, C), jnp.float32),
        grid_spec=pltpu.PrefetchScalarGridSpec(
            num_scalar_prefetch=0,
            grid=(B,),
            in_specs=[
                x_spec,
                pl.BlockSpec((C, 3 * C), lambda b: (0, 0)),   # fused Wqkv
                pl.BlockSpec((1, 3 * C), lambda b: (0, 0)),   # fused bqkv
                pl.BlockSpec((C, C), lambda b: (0, 0)),       # Wproj
                pl.BlockSpec((1, C), lambda b: (0, 0)),       # bproj
            ],
            out_specs=x_spec,
        ),
        compiler_params=pltpu.CompilerParams(
            dimension_semantics=("parallel",),
            vmem_limit_bytes=64 * 1024 * 1024,
        ),
    )(x_bf16, wqkv, bqkv, wp, bp)


def _reference(x, params, n_head, band_width):
    """Pure-JAX f32 reference matching the PyTorch forward (eval mode)."""
    B, T, C = x.shape
    hd = C // n_head
    q = x @ params["wq"] + params["bq"]
    k = x @ params["wk"] + params["bk"]
    v = x @ params["wv"] + params["bv"]
    q = q.reshape(B, T, n_head, hd).transpose(0, 2, 1, 3)
    k = k.reshape(B, T, n_head, hd).transpose(0, 2, 1, 3)
    v = v.reshape(B, T, n_head, hd).transpose(0, 2, 1, 3)
    att = jnp.einsum("bhqd,bhkd->bhqk", q, k) / math.sqrt(hd)
    row = jnp.arange(T)[:, None]
    col = jnp.arange(T)[None, :]
    allowed = (col <= row) & (col >= row - band_width)
    att = jnp.where(allowed[None, None], att, -jnp.inf)
    att = jax.nn.softmax(att, axis=-1)
    y = jnp.einsum("bhqk,bhkd->bhqd", att, v)
    y = y.transpose(0, 2, 1, 3).reshape(B, T, C)
    return y @ params["wp"] + params["bp"]


if __name__ == "__main__":
    # Small shapes consistent with the module
    B, T = 2, 8            # batch, sequence (block_size = T)
    C = 32                 # n_embd
    n_head = 4
    band_width = 4

    key = jax.random.PRNGKey(0)
    keys = jax.random.split(key, 9)
    wscale = 1.0 / math.sqrt(C)
    params = {
        "wq": jax.random.uniform(keys[0], (C, C), jnp.float32, -wscale, wscale),
        "wk": jax.random.uniform(keys[1], (C, C), jnp.float32, -wscale, wscale),
        "wv": jax.random.uniform(keys[2], (C, C), jnp.float32, -wscale, wscale),
        "wp": jax.random.uniform(keys[3], (C, C), jnp.float32, -wscale, wscale),
        "bq": jax.random.uniform(keys[4], (1, C), jnp.float32, -wscale, wscale),
        "bk": jax.random.uniform(keys[5], (1, C), jnp.float32, -wscale, wscale),
        "bv": jax.random.uniform(keys[6], (1, C), jnp.float32, -wscale, wscale),
        "bp": jax.random.uniform(keys[7], (1, C), jnp.float32, -wscale, wscale),
    }
    x = jax.random.normal(keys[8], (B, T, C), jnp.float32)

    out = causal_self_attention(x, params, n_head=n_head, band_width=band_width)
    out = jax.block_until_ready(out)

    ref = _reference(x, params, n_head, band_width)
    # Kernel uses bf16 matmul operands (f32 accumulation) + approx reciprocal,
    # so tolerances are loosened vs. the pure-f32 reference.
    np.testing.assert_allclose(np.asarray(out), np.asarray(ref), rtol=2e-2, atol=2e-2)
    print("KERNEL_OK")
</pallas_src>

<mosaic_0001>
module attributes {stable_mosaic.version = 11 : i64} {
  func.func @_attn_kernel(%arg0: i32, %arg1: memref<1x8x32xbf16, #tpu.memory_space<vmem>>, %arg2: memref<32x96xbf16, #tpu.memory_space<vmem>>, %arg3: memref<1x96xf32, #tpu.memory_space<vmem>>, %arg4: memref<32x32xbf16, #tpu.memory_space<vmem>>, %arg5: memref<1x32xf32, #tpu.memory_space<vmem>>, %arg6: memref<1x8x32xf32, #tpu.memory_space<vmem>>) attributes {dimension_semantics = [#tpu.dimension_semantics<parallel>], iteration_bounds = array<i64: 2>, scalar_prefetch = 0 : i64, scratch_operands = 0 : i64, tpu.core_type = #tpu.core_type<tc>, window_params = [{transform_indices = @transform_0, window_bounds = array<i64: 1, 8, 32>}, {pipeline_mode = #tpu.pipeline_mode<synchronous>, transform_indices = @transform_1, window_bounds = array<i64: 32, 96>}, {pipeline_mode = #tpu.pipeline_mode<synchronous>, transform_indices = @transform_2, window_bounds = array<i64: 1, 96>}, {pipeline_mode = #tpu.pipeline_mode<synchronous>, transform_indices = @transform_3, window_bounds = array<i64: 32, 32>}, {pipeline_mode = #tpu.pipeline_mode<synchronous>, transform_indices = @transform_4, window_bounds = array<i64: 1, 32>}, {transform_indices = @transform_5, window_bounds = array<i64: 1, 8, 32>}]} {
    %c0 = arith.constant 0 : index
    %c0_0 = arith.constant 0 : index
    %c0_1 = arith.constant 0 : index
    %0 = vector.load %arg1[%c0, %c0_0, %c0_1] : memref<1x8x32xbf16, #tpu.memory_space<vmem>>, vector<1x8x32xbf16>
    %1 = vector.shape_cast %0 : vector<1x8x32xbf16> to vector<8x32xbf16>
    %c0_2 = arith.constant 0 : index
    %c0_3 = arith.constant 0 : index
    %2 = vector.load %arg2[%c0_2, %c0_3] : memref<32x96xbf16, #tpu.memory_space<vmem>>, vector<32x96xbf16>
    %cst = arith.constant dense<0.000000e+00> : vector<8x96xf32>
    %3 = tpu.matmul %1, %2, %cst {dimension_numbers = #tpu.dot_dimension_numbers<[1], [0], [0], [1], [0, 0, 1, 1], [], []>} : vector<8x32xbf16>, vector<32x96xbf16>, vector<8x96xf32> -> vector<8x96xf32>
    %c0_4 = arith.constant 0 : index
    %c0_5 = arith.constant 0 : index
    %4 = vector.load %arg3[%c0_4, %c0_5] : memref<1x96xf32, #tpu.memory_space<vmem>>, vector<1x96xf32>
    %5 = vector.broadcast %4 : vector<1x96xf32> to vector<8x96xf32>
    %6 = arith.addf %3, %5 : vector<8x96xf32>
    %7 = vector.extract_strided_slice %6 {offsets = [0, 0], sizes = [8, 32], strides = [1, 1]} : vector<8x96xf32> to vector<8x32xf32>
    %cst_6 = arith.constant 0.353553385 : f32
    %8 = vector.broadcast %cst_6 : f32 to vector<8x32xf32>
    %9 = arith.mulf %7, %8 : vector<8x32xf32>
    %10 = vector.extract_strided_slice %6 {offsets = [0, 32], sizes = [8, 32], strides = [1, 1]} : vector<8x96xf32> to vector<8x32xf32>
    %11 = vector.extract_strided_slice %6 {offsets = [0, 64], sizes = [8, 32], strides = [1, 1]} : vector<8x96xf32> to vector<8x32xf32>
    %12 = vector.extract_strided_slice %9 {offsets = [0, 0], sizes = [8, 8], strides = [1, 1]} : vector<8x32xf32> to vector<8x8xf32>
    %13 = vector.extract_strided_slice %9 {offsets = [0, 8], sizes = [8, 8], strides = [1, 1]} : vector<8x32xf32> to vector<8x8xf32>
    %14 = vector.extract_strided_slice %9 {offsets = [0, 16], sizes = [8, 8], strides = [1, 1]} : vector<8x32xf32> to vector<8x8xf32>
    %15 = vector.extract_strided_slice %9 {offsets = [0, 24], sizes = [8, 8], strides = [1, 1]} : vector<8x32xf32> to vector<8x8xf32>
    %16 = vector.shape_cast %12 : vector<8x8xf32> to vector<1x8x8xf32>
    %17 = vector.shape_cast %13 : vector<8x8xf32> to vector<1x8x8xf32>
    %18 = vector.shape_cast %14 : vector<8x8xf32> to vector<1x8x8xf32>
    %19 = vector.shape_cast %15 : vector<8x8xf32> to vector<1x8x8xf32>
    %20 = tpu.concatenate %16, %17, %18, %19 in 0 : vector<1x8x8xf32>, vector<1x8x8xf32>, vector<1x8x8xf32>, vector<1x8x8xf32> -> vector<4x8x8xf32>
    %21 = arith.truncf %20 : vector<4x8x8xf32> to vector<4x8x8xbf16>
    %22 = vector.extract_strided_slice %10 {offsets = [0, 0], sizes = [8, 8], strides = [1, 1]} : vector<8x32xf32> to vector<8x8xf32>
    %23 = vector.extract_strided_slice %10 {offsets = [0, 8], sizes = [8, 8], strides = [1, 1]} : vector<8x32xf32> to vector<8x8xf32>
    %24 = vector.extract_strided_slice %10 {offsets = [0, 16], sizes = [8, 8], strides = [1, 1]} : vector<8x32xf32> to vector<8x8xf32>
    %25 = vector.extract_strided_slice %10 {offsets = [0, 24], sizes = [8, 8], strides = [1, 1]} : vector<8x32xf32> to vector<8x8xf32>
    %26 = vector.shape_cast %22 : vector<8x8xf32> to vector<1x8x8xf32>
    %27 = vector.shape_cast %23 : vector<8x8xf32> to vector<1x8x8xf32>
    %28 = vector.shape_cast %24 : vector<8x8xf32> to vector<1x8x8xf32>
    %29 = vector.shape_cast %25 : vector<8x8xf32> to vector<1x8x8xf32>
    %30 = tpu.concatenate %26, %27, %28, %29 in 0 : vector<1x8x8xf32>, vector<1x8x8xf32>, vector<1x8x8xf32>, vector<1x8x8xf32> -> vector<4x8x8xf32>
    %31 = arith.truncf %30 : vector<4x8x8xf32> to vector<4x8x8xbf16>
    %32 = vector.extract_strided_slice %11 {offsets = [0, 0], sizes = [8, 8], strides = [1, 1]} : vector<8x32xf32> to vector<8x8xf32>
    %33 = vector.extract_strided_slice %11 {offsets = [0, 8], sizes = [8, 8], strides = [1, 1]} : vector<8x32xf32> to vector<8x8xf32>
    %34 = vector.extract_strided_slice %11 {offsets = [0, 16], sizes = [8, 8], strides = [1, 1]} : vector<8x32xf32> to vector<8x8xf32>
    %35 = vector.extract_strided_slice %11 {offsets = [0, 24], sizes = [8, 8], strides = [1, 1]} : vector<8x32xf32> to vector<8x8xf32>
    %36 = vector.shape_cast %32 : vector<8x8xf32> to vector<1x8x8xf32>
    %37 = vector.shape_cast %33 : vector<8x8xf32> to vector<1x8x8xf32>
    %38 = vector.shape_cast %34 : vector<8x8xf32> to vector<1x8x8xf32>
    %39 = vector.shape_cast %35 : vector<8x8xf32> to vector<1x8x8xf32>
    %40 = tpu.concatenate %36, %37, %38, %39 in 0 : vector<1x8x8xf32>, vector<1x8x8xf32>, vector<1x8x8xf32>, vector<1x8x8xf32> -> vector<4x8x8xf32>
    %41 = arith.truncf %40 : vector<4x8x8xf32> to vector<4x8x8xbf16>
    %cst_7 = arith.constant dense<0.000000e+00> : vector<4x8x8xf32>
    %42 = tpu.matmul %21, %31, %cst_7 {dimension_numbers = #tpu.dot_dimension_numbers<[2], [2], [1], [1], [0, 0, 0, 1, 1, 1], [0], [0]>} : vector<4x8x8xbf16>, vector<4x8x8xbf16>, vector<4x8x8xf32> -> vector<4x8x8xf32>
    %43 = tpu.iota {dimensions = array<i32: 1>} : vector<1x8x8xi32>
    %44 = tpu.iota {dimensions = array<i32: 2>} : vector<1x8x8xi32>
    %45 = arith.cmpi sle, %44, %43 : vector<1x8x8xi32>
    %c4_i32 = arith.constant 4 : i32
    %46 = vector.broadcast %c4_i32 : i32 to vector<1x8x8xi32>
    %47 = arith.subi %43, %46 : vector<1x8x8xi32>
    %48 = arith.cmpi sge, %44, %47 : vector<1x8x8xi32>
    %49 = arith.andi %45, %48 : vector<1x8x8xi1>
    %cst_8 = arith.constant -1.000000e+30 : f32
    %50 = vector.shape_cast %49 : vector<1x8x8xi1> to vector<1x8x8xi1>
    %51 = vector.broadcast %50 : vector<1x8x8xi1> to vector<4x8x8xi1>
    %52 = vector.broadcast %cst_8 : f32 to vector<4x8x8xf32>
    %53 = arith.select %51, %42, %52 : vector<4x8x8xi1>, vector<4x8x8xf32>
    %cst_9 = arith.constant dense<0xFF800000> : vector<4x8xf32>
    %54 = vector.multi_reduction <maximumf>, %53, %cst_9 [2] : vector<4x8x8xf32> to vector<4x8xf32>
    %55 = vector.shape_cast %54 : vector<4x8xf32> to vector<4x8x1xf32>
    %56 = vector.broadcast %55 : vector<4x8x1xf32> to vector<4x8x8xf32>
    %57 = arith.subf %53, %56 : vector<4x8x8xf32>
    %58 = math.exp %57 : vector<4x8x8xf32>
    %cst_10 = arith.constant dense<0.000000e+00> : vector<4x8xf32>
    %59 = vector.multi_reduction <add>, %58, %cst_10 [2] : vector<4x8x8xf32> to vector<4x8xf32>
    %60 = vector.shape_cast %59 : vector<4x8xf32> to vector<4x8x1xf32>
    %61 = tpu.reciprocal %60 {approx = true} : vector<4x8x1xf32> -> vector<4x8x1xf32>
    %62 = vector.broadcast %61 : vector<4x8x1xf32> to vector<4x8x8xf32>
    %63 = arith.mulf %58, %62 : vector<4x8x8xf32>
    %64 = arith.truncf %63 : vector<4x8x8xf32> to vector<4x8x8xbf16>
    %cst_11 = arith.constant dense<0.000000e+00> : vector<4x8x8xf32>
    %65 = tpu.matmul %64, %41, %cst_11 {dimension_numbers = #tpu.dot_dimension_numbers<[2], [1], [1], [2], [0, 0, 0, 1, 1, 2], [0], [0]>} : vector<4x8x8xbf16>, vector<4x8x8xbf16>, vector<4x8x8xf32> -> vector<4x8x8xf32>
    %66 = vector.extract_strided_slice %65 {offsets = [0, 0, 0], sizes = [1, 8, 8], strides = [1, 1, 1]} : vector<4x8x8xf32> to vector<1x8x8xf32>
    %67 = vector.shape_cast %66 : vector<1x8x8xf32> to vector<8x8xf32>
    %68 = vector.extract_strided_slice %65 {offsets = [1, 0, 0], sizes = [1, 8, 8], strides = [1, 1, 1]} : vector<4x8x8xf32> to vector<1x8x8xf32>
    %69 = vector.shape_cast %68 : vector<1x8x8xf32> to vector<8x8xf32>
    %70 = vector.extract_strided_slice %65 {offsets = [2, 0, 0], sizes = [1, 8, 8], strides = [1, 1, 1]} : vector<4x8x8xf32> to vector<1x8x8xf32>
    %71 = vector.shape_cast %70 : vector<1x8x8xf32> to vector<8x8xf32>
    %72 = vector.extract_strided_slice %65 {offsets = [3, 0, 0], sizes = [1, 8, 8], strides = [1, 1, 1]} : vector<4x8x8xf32> to vector<1x8x8xf32>
    %73 = vector.shape_cast %72 : vector<1x8x8xf32> to vector<8x8xf32>
    %74 = tpu.concatenate %67, %69, %71, %73 in 1 : vector<8x8xf32>, vector<8x8xf32>, vector<8x8xf32>, vector<8x8xf32> -> vector<8x32xf32>
    %75 = arith.truncf %74 : vector<8x32xf32> to vector<8x32xbf16>
    %c0_12 = arith.constant 0 : index
    %c0_13 = arith.constant 0 : index
    %76 = vector.load %arg4[%c0_12, %c0_13] : memref<32x32xbf16, #tpu.memory_space<vmem>>, vector<32x32xbf16>
    %cst_14 = arith.constant dense<0.000000e+00> : vector<8x32xf32>
    %77 = tpu.matmul %75, %76, %cst_14 {dimension_numbers = #tpu.dot_dimension_numbers<[1], [0], [0], [1], [0, 0, 1, 1], [], []>} : vector<8x32xbf16>, vector<32x32xbf16>, vector<8x32xf32> -> vector<8x32xf32>
    %c0_15 = arith.constant 0 : index
    %c0_16 = arith.constant 0 : index
    %78 = vector.load %arg5[%c0_15, %c0_16] : memref<1x32xf32, #tpu.memory_space<vmem>>, vector<1x32xf32>
    %79 = vector.broadcast %78 : vector<1x32xf32> to vector<8x32xf32>
    %80 = arith.addf %77, %79 : vector<8x32xf32>
    %c0_17 = arith.constant 0 : index
    %c0_18 = arith.constant 0 : index
    %c0_19 = arith.constant 0 : index
    %81 = vector.load %arg6[%c0_17, %c0_18, %c0_19] : memref<1x8x32xf32, #tpu.memory_space<vmem>>, vector<1x8x32xf32>
    %82 = vector.shape_cast %81 : vector<1x8x32xf32> to vector<8x32xf32>
    %83 = vector.shape_cast %80 : vector<8x32xf32> to vector<1x8x32xf32>
    tpu.vector_store %arg6[%c0_17, %c0_18, %c0_19], %83 {strides = array<i32>} : memref<1x8x32xf32, #tpu.memory_space<vmem>>, vector<1x8x32xf32>,
    return
  }
  func.func @transform_0(%arg0: i32) -> (i32, i32, i32) {
    %c0_i32 = arith.constant 0 : i32
    %c0_i32_0 = arith.constant 0 : i32
    %c0_i32_1 = arith.constant 0 : i32
    return %arg0, %c0_i32, %c0_i32_0 : i32, i32, i32
  }
  func.func @transform_1(%arg0: i32) -> (i32, i32) {
    %c0_i32 = arith.constant 0 : i32
    %c0_i32_0 = arith.constant 0 : i32
    %c0_i32_1 = arith.constant 0 : i32
    return %c0_i32, %c0_i32_0 : i32, i32
  }
  func.func @transform_2(%arg0: i32) -> (i32, i32) {
    %c0_i32 = arith.constant 0 : i32
    %c0_i32_0 = arith.constant 0 : i32
    %c0_i32_1 = arith.constant 0 : i32
    return %c0_i32, %c0_i32_0 : i32, i32
  }
  func.func @transform_3(%arg0: i32) -> (i32, i32) {
    %c0_i32 = arith.constant 0 : i32
    %c0_i32_0 = arith.constant 0 : i32
    %c0_i32_1 = arith.constant 0 : i32
    return %c0_i32, %c0_i32_0 : i32, i32
  }
  func.func @transform_4(%arg0: i32) -> (i32, i32) {
    %c0_i32 = arith.constant 0 : i32
    %c0_i32_0 = arith.constant 0 : i32
    %c0_i32_1 = arith.constant 0 : i32
    return %c0_i32, %c0_i32_0 : i32, i32
  }
  func.func @transform_5(%arg0: i32) -> (i32, i32, i32) {
    %c0_i32 = arith.constant 0 : i32
    %c0_i32_0 = arith.constant 0 : i32
    %c0_i32_1 = arith.constant 0 : i32
    return %arg0, %c0_i32, %c0_i32_0 : i32, i32, i32
  }
}

</mosaic_0001>

<bundles_post_ra>
// kernel: tpu_custom_call.1
= control target key start
LH: loop header
LB: loop body
LE: loop exit
PB: predicated region body
PF: predicated region fallthrough
CT: control target
= control target key end

     0   :  { %10 = vsyncpa [#allocation3], 0  ;;  %s1933_s0 = inlined_call_operand.hbm [shape: bf16[2,8,32], index: 0, kind: input, shape index: {}]   ;;  %s1934_s1 = inlined_call_operand.hbm [shape: bf16[32,96], index: 1, kind: input, shape index: {}]   ;;  %s1935_s2 = inlined_call_operand.hbm [shape: f32[1,96], index: 2, kind: input, shape index: {}]   ;;  %s1936_s3 = inlined_call_operand.hbm [shape: bf16[32,32], index: 3, kind: input, shape index: {}]   ;;  %s1937_s4 = inlined_call_operand.hbm [shape: f32[1,32], index: 4, kind: input, shape index: {}]   ;;  %s1938_s5 = inlined_call_operand.hbm [shape: f32[2,8,32], index: 5, kind: output, shape index: {}]  }
   0x1   :  { %12 = vsyncpa [#allocation3 + $0x1], 0 }
   0x2   :  { %13 = vsyncpa [#allocation6], 0 }
   0x3   :  { %14 = vsyncpa [#allocation9], 0 }
   0x4   :  { %15 = vsyncpa [#allocation4], 0 }
   0x5   :  { %17 = vsyncpa [#allocation4 + $0x1], 0  ;;  %s1559_s18 = smov 0   ;;  %s1561_s19 = smov 0  }
   0x6   :  { %s1563_s20 = smov 0   ;;  %s1565_s21 = smov 0  }
   0x7 LB: > { %s1511_s22 = smov [#allocation5]   ;;  %s1580_s24 = sadd.s32 4294967295, %s1509_s21   ;;  %s1509_s21 = sphi %s1565_s21, %s1964_s21   ;;  %s1505_s20 = sphi %s1563_s20, %s1963_s20   ;;  %s1501_s19 = sphi %s1561_s19, %s1962_s19   ;;  %s1497_s18 = sphi %s1559_s18, %s1961_s18  }
   0x8   : > { %s176_s23 = sshll.u32 %s1511_s22, 4  ;;  %p1052_p0 = scmp.ge.s32.totalorder %s1509_s21, 1  ;;  %s1585_s23 = int_to_ptr.vmem [resolvable:$true] %s176_s23 }
   0x9   : > { %p1939_p1 = scmp.eq.s32.totalorder %s1580_s24, 0  ;;  %p164_p2 = scmp.lt.s32.totalorder %s1509_s21, 3 }
   0xa   : > { %s1512_s26 = smov [#allocation8]   ;;  %s1513_s29 = smov [#allocation7]  }
   0xb   : > { %p1587_p3 = pnand %p1052_p0, %p164_p2  ;;  %s200_s27 = sshll.u32 %s1512_s26, 4  ;;  %s1600_s27 = int_to_ptr.vmem [resolvable:$true] %s200_s27 }
   0xc   : > { %s190_s30 = sshll.u32 %s1513_s29, 4  ;;  %s1293_s8 = scalar_lea.hbm %s1934_s1, 256  ;;  %s1602_s30 = int_to_ptr.vmem [resolvable:$true] %s190_s30 }
   0xd   : > { %s1942_s25 = scalar_select %p1587_p3, 1, 0 }
   0xe   : > { %p1194_p5 = pneg %p1587_p3  ;;  %p1294_p7 = scmp.ne.s32.totalorder %s1934_s1, %s1293_s8 }
   0xf   : > { %p1300_p11 = scmp.lt.u32.totalorder %s1293_s8, %s1934_s1 }
  0x10   : > { %p1596_p6 = pnand %p1194_p5, %p1939_p1 }
  0x12   : > { %p1612_p8 = pneg %p1596_p6 }
  0x14   : > { %p1296_p9 = pnand %p1612_p8, %p1294_p7 }
  0x16   : > { %p1297_p10 = pneg %p1296_p9 }
  0x18   : > { %p1302_p12 = pnand %p1300_p11, %p1297_p10 }
  0x1a   : > { %1305 = shalt.err (!%p1302_p12)
}
  0x1b   : > { %s1306_s14 = scalar_lea.vmem %s1585_s23, 256  ;;  %p1314_p5 = scmp.lt.s32.totalorder %s1585_s23, %s1585_s23 }
  0x1c   : > { %p1307_p13 = scmp.ne.s32.totalorder %s1585_s23, %s1306_s14  ;;  %p1315_p4 = scmp.lt.s32.totalorder %s1306_s14, %s1306_s14 }
  0x1e   : > { %p1309_p0 = pnand %p1307_p13, %p1612_p8  ;;  %p1316_p7 = por %p1315_p4, %p1314_p5 }
  0x20   : > { %p1310_p2 = pneg %p1309_p0 }
  0x22   : > { %p1317_p9 = pnand %p1316_p7, %p1310_p2 }
  0x24   : > { %1320 = shalt.err (!%p1317_p9)
}
  0x25   : > { %s1514_s15 = smov 64   ;;  %s1515_s16 = smov 4  }
  0x26   : > { %1197 = dma.hbm_to_vmem [thread:$0]  (!%p1596_p6), %s1934_s1, 256, %s1585_s23, [#allocation6], %s1514_s15, %s1514_s15, %s1515_s16  }
  0x27   : > { %s1321_s6 = scalar_lea.hbm %s1936_s3, 256 }
  0x28   : > { %p1322_p4 = scmp.ne.s32.totalorder %s1936_s3, %s1321_s6  ;;  %p1328_p12 = scmp.lt.u32.totalorder %s1321_s6, %s1936_s3 }
  0x2a   : > { %p1324_p10 = pnand %p1322_p4, %p1612_p8 }
  0x2c   : > { %p1325_p11 = pneg %p1324_p10 }
  0x2e   : > { %p1330_p13 = pnand %p1328_p12, %p1325_p11 }
  0x30   : > { %1333 = shalt.err (!%p1330_p13)
}
  0x31   : > { %s1334_s23 = scalar_lea.vmem %s1600_s27, 256  ;;  %p1342_p7 = scmp.lt.s32.totalorder %s1600_s27, %s1600_s27 }
  0x32   : > { %p1335_p0 = scmp.ne.s32.totalorder %s1600_s27, %s1334_s23  ;;  %p1343_p9 = scmp.lt.s32.totalorder %s1334_s23, %s1334_s23 }
  0x34   : > { %p1337_p2 = pnand %p1335_p0, %p1612_p8  ;;  %p1344_p4 = por %p1343_p9, %p1342_p7 }
  0x36   : > { %p1338_p5 = pneg %p1337_p2 }
  0x38   : > { %p1345_p10 = pnand %p1344_p4, %p1338_p5 }
  0x3a   : > { %1348 = shalt.err (!%p1345_p10)
}
  0x3b   : > { %1203 = dma.hbm_to_vmem [thread:$0]  (!%p1596_p6), %s1936_s3, 256, %s1600_s27, [#allocation9], %s1514_s15, %s1514_s15, %s1515_s16  }
  0x3c   : > { %s1349_s22 = scalar_lea.hbm %s1935_s2, 16 }
  0x3d   : > { %p1350_p11 = scmp.ne.s32.totalorder %s1935_s2, %s1349_s22  ;;  %p1356_p0 = scmp.lt.u32.totalorder %s1349_s22, %s1935_s2 }
  0x3f   : > { %p1352_p12 = pnand %p1350_p11, %p1612_p8 }
  0x41   : > { %p1353_p13 = pneg %p1352_p12 }
  0x43   : > { %p1358_p2 = pnand %p1356_p0, %p1353_p13 }
  0x45   : > { %1361 = shalt.err (!%p1358_p2)
}
  0x46   : > { %s1362_s27 = scalar_lea.vmem %s1602_s30, 16  ;;  %s1369_s15 = scalar_lea.vmem %s1602_s30, 32 }
  0x47   : > { %p1363_p5 = scmp.ne.s32.totalorder %s1602_s30, %s1362_s27  ;;  %p1370_p4 = scmp.lt.s32.totalorder %s1602_s30, %s1602_s30 }
  0x48   : > { %p1371_p10 = scmp.lt.s32.totalorder %s1369_s15, %s1362_s27 }
  0x49   : > { %p1365_p7 = pnand %p1363_p5, %p1612_p8 }
  0x4a   : > { %p1372_p11 = por %p1371_p10, %p1370_p4 }
  0x4b   : > { %p1366_p9 = pneg %p1365_p7 }
  0x4d   : > { %p1373_p12 = pnand %p1372_p11, %p1366_p9 }
  0x4f   : > { %1376 = shalt.err (!%p1373_p12)
}
  0x50   : > { %1200 = dma.hbm_to_vmem [thread:$0]  (!%p1596_p6), %s1935_s2, 16, %s1602_s30, [#allocation6]  }
  0x51   : > { %s1516_s9 = smov [#allocation10]   ;;  %s1377_s13 = scalar_lea.hbm %s1937_s4, 16 }
  0x52   : > { %s214_s10 = sshll.u32 %s1516_s9, 4  ;;  %p1378_p13 = scmp.ne.s32.totalorder %s1937_s4, %s1377_s13  ;;  %s215_s10 = int_to_ptr.vmem [resolvable:$true] %s214_s10 }
  0x53   : > { %p1384_p5 = scmp.lt.u32.totalorder %s1377_s13, %s1937_s4 }
  0x54   : > { %p1380_p0 = pnand %p1378_p13, %p1612_p8 }
  0x56   : > { %p1381_p2 = pneg %p1380_p0 }
  0x58   : > { %p1386_p7 = pnand %p1384_p5, %p1381_p2 }
  0x5a   : > { %1389 = shalt.err (!%p1386_p7)
}
  0x5b   : > { %s1390_s30 = scalar_lea.vmem %s215_s10, 16  ;;  %s1397_s29 = scalar_lea.vmem %s215_s10, 32 }
  0x5c   : > { %p1391_p9 = scmp.ne.s32.totalorder %s215_s10, %s1390_s30  ;;  %p1398_p11 = scmp.lt.s32.totalorder %s215_s10, %s215_s10 }
  0x5d   : > { %p1399_p12 = scmp.lt.s32.totalorder %s1397_s29, %s1390_s30 }
  0x5e   : > { %p1393_p4 = pnand %p1391_p9, %p1612_p8 }
  0x5f   : > { %p1400_p1 = por %p1399_p12, %p1398_p11 }
  0x60   : > { %p1394_p10 = pneg %p1393_p4 }
  0x62   : > { %p1401_p3 = pnand %p1400_p1, %p1394_p10 }
  0x64   : > { %1404 = shalt.err (!%p1401_p3)
}
  0x65   : > { %1206 = dma.hbm_to_vmem [thread:$0]  (!%p1596_p6), %s1937_s4, 16, %s215_s10, [#allocation9]  }
  0x66   : > { %s1051_s11 = sadd.s32 4294967294, %s1509_s21   ;;  %s1700_s28 = sadd.s32 1, %s1509_s21  }
  0x67   : > { %s27_s27 = ssub.s32 %s1509_s21, %s1700_s28  ;;  %s30_s15 = sadd.s32 1, %s1505_s20 }
  0x68   : > { %p28_p1 = scmp.eq.s32.totalorder %s27_s27, 0  ;;  %p37_p3 = scmp.ne.s32.totalorder %s1505_s20, %s1501_s19 }
  0x69   : > { %p38_p8 = scmp.eq.s32.totalorder %s1509_s21, 0  ;;  %p43_p13 = scmp.ne.s32.totalorder %s1501_s19, %s1497_s18 }
  0x6a   : > { %s1711_s16 = scalar_select %p28_p1, %s1505_s20, %s30_s15  }
  0x6b   : > { %p1713_p0 = por %p38_p8, %p37_p3  ;;  %p1946_p2 = scmp.eq.s32.totalorder %s1580_s24, 0 }
  0x6c   : > { %p151_p5 = scmp.eq.s32.totalorder %s1580_s24, 1  ;;  %p157_p7 = scmp.eq.s32.totalorder %s1051_s11, 1 }
  0x6d   : > { %p1719_p6 = por %p1946_p2, %p43_p13  ;;  %p1219_p9 = scmp.lt.s32.totalorder %s1509_s21, 2 }
  0x6e   : > { %s225_s10 = sand.u32 1, %s1505_s20   ;;  %p1726_p4 = por %p151_p5, %p37_p3 }
  0x6f   : > { %p1730_p10 = por %p157_p7, %p43_p13  ;;  %s1058_s13 = sshll.u32 %s225_s10, 2 }
  0x70   : > { %s1948_s23 = scalar_select %p1726_p4, 1, 0 }
  0x71   : > { %s1949_s12 = scalar_select %p1730_p10, 1, 0 }
  0x72   : > { %s1059_s14 = sshll.u32 %s1509_s21, 6  ;;  %s229_s30 = scalar_lea.vmem [#allocation2], %s1058_s13 }
  0x73   : > { %s1738_s26 = scalar_lea.hbm %s1933_s0, %s1059_s14  ;;  %s236_s29 = sshll.u32 %s229_s30, 4  ;;  %s1740_s29 = int_to_ptr.vmem [resolvable:$true] %s236_s29 }
  0x74   : > { %p1744_p11 = pnand %p1219_p9, %p1713_p0  ;;  %s226_s7 = scalar_lea.sflag [#allocation3], %s225_s10 }
  0x75   : > { %s1405_s11 = scalar_lea.hbm %s1738_s26, 64  ;;  %s1410_s13 = scalar_lea.hbm %s1933_s0, 128 }
  0x76   : > { %p1406_p12 = scmp.ne.s32.totalorder %s1738_s26, %s1405_s11  ;;  %p1407_p1 = pneg %p1744_p11 }
  0x77   : > { %p1411_p13 = scmp.lt.u32.totalorder %s1738_s26, %s1933_s0  ;;  %p1412_p0 = scmp.lt.u32.totalorder %s1410_s13, %s1405_s11 }
  0x78   : > { %p1408_p3 = pnand %p1407_p1, %p1406_p12  ;;  %p1414_p5 = scmp.lt.u32.totalorder %s1405_s11, %s1738_s26 }
  0x79   : > { %p1413_p2 = por %p1412_p0, %p1411_p13 }
  0x7a   : > { %p1409_p8 = pneg %p1408_p3 }
  0x7b   : > { %p1415_p7 = por %p1414_p5, %p1413_p2 }
  0x7d   : > { %p1416_p9 = pnand %p1415_p7, %p1409_p8 }
  0x7f   : > { %1419 = shalt.err (!%p1416_p9)
}
  0x80   : > { %s1420_s10 = scalar_lea.vmem %s1740_s29, 64  ;;  %s1517_s17 = smov [#allocation2]  }
  0x81   : > { %p1421_p12 = scmp.ne.s32.totalorder %s1740_s29, %s1420_s10  ;;  %s1425_s22 = sshll.u32 %s1517_s17, 4  ;;  %s1426_s22 = int_to_ptr.vmem [resolvable:$false] %s1425_s22 }
  0x82   : > { %s1427_s30 = scalar_lea.vmem %s1426_s22, 128  ;;  %p1428_p4 = scmp.lt.s32.totalorder %s1740_s29, %s1426_s22 }
  0x83   : > { %p1423_p3 = pnand %p1421_p12, %p1407_p1  ;;  %p1429_p13 = scmp.lt.s32.totalorder %s1427_s30, %s1420_s10 }
  0x85   : > { %p1424_p10 = pneg %p1423_p3  ;;  %p1430_p0 = por %p1429_p13, %p1428_p4 }
  0x87   : > { %p1431_p2 = pnand %p1430_p0, %p1424_p10 }
  0x89   : > { %1434 = shalt.err (!%p1431_p2)
}
  0x8a   : > { %1210 = dma.hbm_to_vmem [thread:$0]  (!%p1744_p11), %s1738_s26, 64, %s1740_s29, %s226_s7  }
  0x8b   : > { %p1951_p8 = scmp.ne.s32.totalorder %s1942_s25, 0 }
  0x8c   : > { %s1776_s11 = sand.u32 (!%p1951_p8), 1, %s1501_s19  }
  0x8d   : > { %245 = sbr.rel (%p1951_p8) target bundleno = 1715 (0x6b3), region = 40  ;;  %s1061_s27 = sshll.u32 (!%p1951_p8), %s1776_s11, 2 }
  0x8e   : > { %s248_s15 = scalar_lea.sflag (!%p1951_p8), [#allocation3], %s1776_s11  ;;  %s251_s13 = scalar_lea.vmem (!%p1951_p8), [#allocation2], %s1061_s27 }
  0x94   : > { %1480 = dma.done.wait (%p1719_p6), %s248_s15, 64  }
  0x95   : > { %1482 = vsyncadd (%p1719_p6), %s248_s15, 4294967232  ;;  %p1952_p4 = scmp.eq.s32.totalorder %s1580_s24, 0 }
  0x97   : > { %1484 = dma.done.wait (%p1952_p4), [#allocation6], 272   ;;  %p1953_p10 = pmov %p1952_p4 }
  0x98   : > { %p1954_p11 = pmov %p1952_p4 }
  0x99   : > { %1486 = vsyncadd (%p1953_p10), [#allocation6], 4294967024 }
  0x9a   : > { %1488 = dma.done.wait (%p1954_p11), [#allocation9], 272   ;;  %p1955_p1 = pmov %p1952_p4 }
  0x9b   : > { %v1518_v0 = vmov 0.0   ;;  %vm1519_vm0 = vmmov 0   ;;  %v1273_v1 = vld [vmem:[#allocation5] sm:$0xff]   ;;  %v1274_v2 = vld [vmem:[#allocation5 + $0x8] sm:$0xff]   ;;  %v295_v3 = vld [vmem:[%s251_s13] sm:$0xf]  ;;  %v589_v33 = vlaneseq }
  0x9c   : > { %1490 = vsyncadd (%p1955_p1), [#allocation9], 4294967024  ;;  %1110 = vmatprep.subr.bf16.mxu0 %v1518_v0  ;;  %1114 = vmatprep.mubr.msk.bf16.mxu0 %vm1519_vm0, %v1518_v0  ;;  %vm319_vm1 = vcmask 261120   ;;  %v1067_v4 = vld [vmem:[#allocation7] ss:$0 sm:$0xff]  ;;  %s1520_s25 = smov 104  }
  0x9d   : > { %1118 = vmatprep.subr.bf16.mxu1 %v1518_v0  ;;  %1120 = vmatprep.mubr.msk.bf16.mxu1 %vm1519_vm0, %v1518_v0  ;;  %s1521_s9 = smov 120   ;;  %s1522_s26 = smov 112   ;;  %vm395_vm2 = vcmask 64512   ;;  %v590_v34 = vshrl.u32 %v589_v33, 7  ;;  %v592_v35 = vand.u32 127, %v589_v33  ;;  %vm656_vm6 = vcmask 1043456  }
  0x9e   : > { %1111 = vmatpush3.bf16.msra.mxu0 %v1273_v1  ;;  %s1523_s29 = smov 96   ;;  %s1524_s6 = smov 64   ;;  %vm857_vm7 = vcmask 130048   ;;  %vm859_vm8 = vcmask 195584  }
  0x9f   : > { %1112 = vmatprep.subr.bf16.mxu0 %v1518_v0  ;;  %v1075_v36 = vadd.s32 4294967292, %v590_v34  ;;  %vm593_vm3 = vcmp.le.s32.totalorder %v592_v35, %v590_v34  ;;  %s1525_s7 = smov 8   ;;  %s1526_s8 = smov 16  }
  0xa0   : > { %s1527_s14 = smov 24   ;;  %s1066_s10 = sshll.u32 %s1776_s11, 3 }
  0xa1   : > { %vm595_vm4 = vcmp.ge.s32.totalorder %v592_v35, %v1075_v36  ;;  %s1085_s17 = sshll.u32 %s1580_s24, 7  ;;  %s293_s22 = scalar_lea.vmem [#allocation11], %s1066_s10 }
  0xa2   : > { %1113 = vmatpush3.bf16.msra.mxu0 %v1274_v2  ;;  %vm1835_vm5 = vmand %vm593_vm3, %vm595_vm4  ;;  %s943_s30 = sshll.u32 %s293_s22, 4  ;;  %s1888_s13 = scalar_lea.hbm %s1938_s5, %s1085_s17  ;;  %s1890_s30 = int_to_ptr.vmem [resolvable:$true] %s943_s30 }
  0xa3   : > { %1124 = vmatprep.subr.bf16.mxu0 %v1518_v0  ;;  %s930_s24 = scalar_lea.sflag [#allocation4], %s1776_s11  ;;  %p1958_p5 = scmp.ne.s32.totalorder %s1948_s23, 0 }
  0xa5   : > { %1115 = vmatmul.mubr.msk.bf16.vlgmr.msra.gmra.mrb[0].mxu0 %vm319_vm1, %v295_v3 }
  0xa6   : > { %1126 = vmatprep.mubr.msk.bf16.mxu0 %vm1519_vm0, %v1518_v0 }
 0x178   : > { %v357_v5 = vpop.f32.mrb[0].mxu0 }
 0x179   : > { %v358_v6 = vadd.f32 %v1067_v4, %v357_v5  ;;  %v1116_v7 = vpop.f32.mrb[1].mxu0 }
 0x17a   : > { %v360_v8 = vpop.f32.mrb[2].mxu0 }
 0x17b   : > { %385 = vrot.lane.b32.xlu1 %v358_v6, %s1520_s25  ;;  %379 = vrot.lane.b32.xlu0 %v358_v6, %s1521_s9  ;;  %v1117_v9 = vpop.f32.mrb[3].mxu0  ;;  %v1803_v10 = vpack.c.bf16 %v358_v6, %v358_v6  ;;  %v363_v11 = vmul.f32 0.35355338, %v358_v6 }
 0x17d   : > { %v374_v20 = vpack.c.bf16 %v363_v11, %v363_v11 }
 0x17f   : > { %382 = vrot.lane.b32.xlu0 %v358_v6, %s1522_s26  ;;  %393 = vrot.lane.b32.xlu1 %v1803_v10, %s1523_s29 }
 0x183   : > { %365 = vrot.lane.b32.xlu1 %v363_v11, %s1521_s9  ;;  %s1528_s9 = smov [#allocation11]  }
 0x1ed   : > { %v386_v12 = vpop.permute.xlu1 %385  ;;  %v380_v13 = vpop.permute.xlu0 %379 }
 0x1ee   : > { %v1806_v14 = vpack.c.bf16 %v386_v12, %v386_v12  ;;  %v1808_v15 = vpack.c.bf16 %v380_v13, %v380_v13 }
 0x1f0   : > { %443 = vrot.lane.b32.xlu0 %v1808_v15, %s1523_s29  ;;  %541 = vrot.lane.b32.xlu1 %v1806_v14, %s1523_s29 }
 0x1f1   : > { %v383_v16 = vpop.permute.xlu0 %382  ;;  %v394_v17 = vpop.permute.xlu1 %393 }
 0x1f2   : > { %v1812_v18 = vpack.c.bf16 %v383_v16, %v383_v16  ;;  %v400_v19 = vsel %vm395_vm2, %v394_v17, 0 }
 0x1f3   : > { %1119 = vmatpush3.bf16.xpose.msra.mxu1 %v400_v19 }
 0x1f4   : > { %492 = vrot.lane.b32.xlu0 %v1812_v18, %s1523_s29  ;;  %371 = vrot.lane.b32.xlu1 %v363_v11, %s1520_s25  ;;  %s1435_s25 = scalar_lea.vmem %s1890_s30, 128 }
 0x1f5   : > { %1130 = vmatprep.subr.bf16.mxu1 %v1518_v0  ;;  %v366_v23 = vpop.permute.xlu1 %365  ;;  %p1436_p6 = scmp.ne.s32.totalorder %s1890_s30, %s1435_s25 }
 0x1f6   : > { %v375_v27 = vpack.c.bf16 %v366_v23, %v366_v23 }
 0x1f7   : > { %p1437_p7 = pnand %p1436_p6, %p1958_p5 }
 0x1f8   : > { %368 = vrot.lane.b32.xlu0 %v363_v11, %s1522_s26  ;;  %s1439_s26 = sshll.u32 %s1528_s9, 4  ;;  %s1440_s26 = int_to_ptr.vmem [resolvable:$false] %s1439_s26 }
 0x1f9   : > { %p1438_p9 = pneg %p1437_p7  ;;  %s1441_s29 = scalar_lea.vmem %s1440_s26, 256 }
 0x1fa   : > { %1121 = vmatmul.mubr.msk.bf16.vlgmr.msra.gmra.mrb[0].mxu1 %vm395_vm2, %v374_v20  ;;  %p1442_p12 = scmp.lt.s32.totalorder %s1890_s30, %s1440_s26  ;;  %p1443_p3 = scmp.lt.s32.totalorder %s1441_s29, %s1435_s25 }
 0x1fb   : > { %1132 = vmatprep.mubr.msk.bf16.mxu1 %vm1519_vm0, %v1518_v0 }
 0x1fc   : > { %p1444_p13 = por %p1443_p3, %p1442_p12 }
 0x1fe   : > { %p1445_p0 = pnand %p1444_p13, %p1438_p9 }
 0x262   : > { %v444_v21 = vpop.permute.xlu0 %443  ;;  %v542_v26 = vpop.permute.xlu1 %541 }
 0x263   : > { %v449_v22 = vsel %vm395_vm2, %v444_v21, 0  ;;  %v547_v29 = vsel %vm395_vm2, %v542_v26, 0 }
 0x264   : > { %1125 = vmatpush3.bf16.xpose.msra.mxu0 %v449_v22 }
 0x265   : > { %1136 = vmatprep.subr.bf16.mxu0 %v1518_v0 }
 0x266   : > { %v493_v24 = vpop.permute.xlu0 %492  ;;  %v372_v31 = vpop.permute.xlu1 %371 }
 0x267   : > { %v498_v25 = vsel %vm395_vm2, %v493_v24, 0  ;;  %v377_v32 = vpack.c.bf16 %v372_v31, %v372_v31 }
 0x268   : > { %1131 = vmatpush3.bf16.xpose.msra.mxu1 %v498_v25 }
 0x269   : > { %1142 = vmatprep.subr.bf16.mxu1 %v1518_v0 }
 0x26a   : > { %v369_v28 = vpop.permute.xlu0 %368 }
 0x26b   : > { %1127 = vmatmul.mubr.msk.bf16.vlgmr.msra.gmra.mrb[4].mxu0 %vm395_vm2, %v375_v27  ;;  %v376_v30 = vpack.c.bf16 %v369_v28, %v369_v28 }
 0x26c   : > { %1137 = vmatpush3.bf16.xpose.msra.mxu0 %v547_v29  ;;  %1138 = vmatprep.mubr.msk.bf16.mxu0 %vm1519_vm0, %v1518_v0 }
 0x26d   : > { %1148 = vmatprep.subr.bf16.mxu0 %v1518_v0 }
 0x26f   : > { %1133 = vmatmul.mubr.msk.bf16.vlgmr.msra.gmra.mrb[4].mxu1 %vm395_vm2, %v376_v30 }
 0x270   : > { %1144 = vmatprep.mubr.msk.bf16.mxu1 %vm1519_vm0, %v1518_v0 }
 0x273   : > { %1139 = vmatmul.mubr.msk.bf16.vlgmr.msra.gmra.mrb[8].mxu0 %vm395_vm2, %v377_v32 }
 0x274   : > { %1150 = vmatprep.mubr.msk.bf16.mxu0 %vm1519_vm0, %v1518_v0 }
 0x2cd   : > { %v436_v38 = vpop.f32.mrb[0].mxu1 }
 0x2ce   : > { %v599_v39 = vsel %vm1835_vm5, %v436_v38, -1e+30  ;;  %v1122_v40 = vpop.f32.mrb[1].mxu1 }
 0x2cf   : > { %v439_v41 = vpop.f32.mrb[2].mxu1  ;;  %v603_v42 = vsel %vm395_vm2, %v599_v39, -inf }
 0x2d0   : > { %604 = vmax.xlane.f32.xlu0 %v603_v42  ;;  %v1123_v43 = vpop.f32.mrb[3].mxu1 }
 0x33e   : > { %v485_v44 = vpop.f32.mrb[4].mxu0 }
 0x33f   : > { %v600_v45 = vsel %vm1835_vm5, %v485_v44, -1e+30  ;;  %v1128_v46 = vpop.f32.mrb[5].mxu0 }
 0x340   : > { %v488_v47 = vpop.f32.mrb[6].mxu0  ;;  %v606_v48 = vsel %vm395_vm2, %v600_v45, -inf }
 0x341   : > { %607 = vmax.xlane.f32.xlu1 %v606_v48  ;;  %v1129_v49 = vpop.f32.mrb[7].mxu0  ;;  %v1275_v47 = vld [vmem:[#allocation8] sm:$0xff]   ;;  %v1276_v48 = vld [vmem:[#allocation8 + $0x8] sm:$0xff]  }
 0x342   : > { %v534_v50 = vpop.f32.mrb[4].mxu1 }
 0x343   : > { %v601_v51 = vsel %vm1835_vm5, %v534_v50, -1e+30  ;;  %v1134_v52 = vpop.f32.mrb[5].mxu1 }
 0x344   : > { %v537_v53 = vpop.f32.mrb[6].mxu1  ;;  %v609_v54 = vsel %vm395_vm2, %v601_v51, -inf }
 0x345   : > { %610 = vmax.xlane.f32.xlu0 %v609_v54  ;;  %v1135_v55 = vpop.f32.mrb[7].mxu1 }
 0x346   : > { %v583_v56 = vpop.f32.mrb[8].mxu0 }
 0x347   : > { %v602_v57 = vsel %vm1835_vm5, %v583_v56, -1e+30  ;;  %v1140_v58 = vpop.f32.mrb[9].mxu0 }
 0x348   : > { %v586_v59 = vpop.f32.mrb[10].mxu0  ;;  %v612_v60 = vsel %vm395_vm2, %v602_v57, -inf }
 0x349   : > { %613 = vmax.xlane.f32.xlu0 %v612_v60  ;;  %v1141_v61 = vpop.f32.mrb[11].mxu0 }
 0x352   : > { %651 = vrot.lane.b32.xlu1 %v1803_v10, %s1524_s6 }
 0x35d   : > { %v605_v62 = vpop.xlane.xlu0 %604 }
 0x35e   : > { %v615_v63 = vsub.f32 %v599_v39, %v605_v62 }
 0x360   : > { %v619_v1 = vmul.f32 1.442695, %v615_v63 }
 0x362   : > { %1277 = vpow2.f32 %v619_v1 }
 0x36c   : > { %v1278_v2 = vpop.eup %1277 }
 0x36d   : > { %v627_v3 = vsel %vm395_vm2, %v1278_v2, 0.0 }
 0x376   : > { %628 = vadd.xlane.f32.xlu1 %v627_v3 }
 0x3ce   : > { %v608_v4 = vpop.xlane.xlu1 %607 }
 0x3cf   : > { %v616_v5 = vsub.f32 %v600_v45, %v608_v4  ;;  %v1080_v4 = vld [vmem:[#allocation10] ss:$0 sm:$0xff] }
 0x3d1   : > { %v621_v6 = vmul.f32 1.442695, %v616_v5 }
 0x3d2   : > { %v611_v7 = vpop.xlane.xlu0 %610  ;;  %v652_v8 = vpop.permute.xlu1 %651 }
 0x3d3   : > { %1279 = vpow2.f32 %v621_v6  ;;  %v617_v9 = vsub.f32 %v601_v51, %v611_v7  ;;  %v658_v11 = vsel %vm656_vm6, %v652_v8, 0 }
 0x3d4   : > { %1143 = vmatpush3.bf16.msra.mxu1 %v658_v11 }
 0x3d5   : > { %v623_v10 = vmul.f32 1.442695, %v617_v9  ;;  %1154 = vmatprep.subr.bf16.mxu1 %v1518_v0 }
 0x3d6   : > { %v614_v12 = vpop.xlane.xlu0 %613 }
 0x3d7   : > { %1281 = vpow2.f32 %v623_v10  ;;  %v618_v13 = vsub.f32 %v602_v57, %v614_v12 }
 0x3d9   : > { %v625_v16 = vmul.f32 1.442695, %v618_v13 }
 0x3db   : > { %1283 = vpow2.f32 %v625_v16 }
 0x3dd   : > { %v1280_v17 = vpop.eup %1279 }
 0x3de   : > { %v630_v19 = vsel %vm395_vm2, %v1280_v17, 0.0 }
 0x3df   : > { %631 = vadd.xlane.f32.xlu0 %v630_v19 }
 0x3e1   : > { %v1282_v20 = vpop.eup %1281 }
 0x3e2   : > { %v633_v21 = vsel %vm395_vm2, %v1282_v20, 0.0 }
 0x3e3   : > { %634 = vadd.xlane.f32.xlu1 %v633_v21 }
 0x3e5   : > { %v1284_v22 = vpop.eup %1283 }
 0x3e6   : > { %v636_v23 = vsel %vm395_vm2, %v1284_v22, 0.0 }
 0x3e7   : > { %637 = vadd.xlane.f32.xlu0 %v636_v23 }
 0x3f4   : > { %748 = vrot.lane.b32.xlu1 %v1812_v18, %s1524_s6 }
 0x3f8   : > { %796 = vrot.lane.b32.xlu1 %v1806_v14, %s1524_s6 }
 0x3fd   : > { %700 = vrot.lane.b32.xlu0 %v1808_v15, %s1524_s6 }
 0x403   : > { %v629_v24 = vpop.xlane.xlu1 %628 }
 0x404   : > { %1285 = vrcp.f32 %v629_v24 }
 0x40e   : > { %v1286_v25 = vpop.eup %1285 }
 0x40f   : > { %v643_v26 = vmul.f32 %v1286_v25, %v1278_v2 }
 0x411   : > { %v647_v27 = vpack.c.bf16 %v643_v26, %v643_v26 }
 0x413   : > { %1145 = vmatmul.mubr.msk.bf16.vlgmr.msra.gmra.mrb[8].mxu1 %vm395_vm2, %v647_v27 }
 0x414   : > { %1156 = vmatprep.mubr.msk.bf16.mxu1 %vm1519_vm0, %v1518_v0 }
 0x46c   : > { %v632_v28 = vpop.xlane.xlu0 %631 }
 0x46d   : > { %1287 = vrcp.f32 %v632_v28 }
 0x470   : > { %v635_v29 = vpop.xlane.xlu1 %634 }
 0x471   : > { %1289 = vrcp.f32 %v635_v29 }
 0x474   : > { %v749_v18 = vpop.permute.xlu1 %748  ;;  %v638_v30 = vpop.xlane.xlu0 %637 }
 0x475   : > { %v754_v14 = vsel %vm656_vm6, %v749_v18, 0  ;;  %1291 = vrcp.f32 %v638_v30 }
 0x476   : > { %1155 = vmatpush3.bf16.msra.mxu1 %v754_v14 }
 0x477   : > { %v1288_v15 = vpop.eup %1287  ;;  %1166 = vmatprep.subr.bf16.mxu1 %v1518_v0 }
 0x478   : > { %v644_v31 = vmul.f32 %v1288_v15, %v1280_v17  ;;  %v701_v32 = vpop.permute.xlu0 %700  ;;  %v797_v34 = vpop.permute.xlu1 %796 }
 0x479   : > { %v706_v33 = vsel %vm656_vm6, %v701_v32, 0  ;;  %v802_v38 = vsel %vm656_vm6, %v797_v34, 0 }
 0x47a   : > { %1149 = vmatpush3.bf16.msra.mxu0 %v706_v33  ;;  %v648_v35 = vpack.c.bf16 %v644_v31, %v644_v31 }
 0x47b   : > { %v1290_v36 = vpop.eup %1289  ;;  %1160 = vmatprep.subr.bf16.mxu0 %v1518_v0 }
 0x47c   : > { %v645_v37 = vmul.f32 %v1290_v36, %v1282_v20 }
 0x47d   : > { %1151 = vmatmul.mubr.msk.bf16.vlgmr.msra.gmra.mrb[12].mxu0 %vm395_vm2, %v648_v35 }
 0x47e   : > { %1161 = vmatpush3.bf16.msra.mxu0 %v802_v38  ;;  %v649_v39 = vpack.c.bf16 %v645_v37, %v645_v37  ;;  %1162 = vmatprep.mubr.msk.bf16.mxu0 %vm1519_vm0, %v1518_v0 }
 0x47f   : > { %v1292_v40 = vpop.eup %1291 }
 0x480   : > { %v646_v41 = vmul.f32 %v1292_v40, %v1284_v22  ;;  %1157 = vmatmul.mubr.msk.bf16.vlgmr.msra.gmra.mrb[12].mxu1 %vm395_vm2, %v649_v39 }
 0x481   : > { %1170 = vmatprep.mubr.msk.bf16.mxu1 %vm1519_vm0, %v1518_v0  ;;  %1167 = vmatpush3.bf16.msra.mxu1 %v1275_v47 }
 0x482   : > { %v650_v42 = vpack.c.bf16 %v646_v41, %v646_v41  ;;  %1168 = vmatprep.subr.bf16.mxu1 %v1518_v0 }
 0x485   : > { %1163 = vmatmul.mubr.msk.bf16.vlgmr.msra.gmra.mrb[16].mxu0 %vm395_vm2, %v650_v42  ;;  %1169 = vmatpush3.bf16.msra.mxu1 %v1276_v48 }
 0x4e6   : > { %v694_v43 = vpop.f32.mrb[8].mxu1 }
 0x4e7   : > { %v1146_v44 = vpop.f32.mrb[9].mxu1 }
 0x4e8   : > { %v697_v45 = vpop.f32.mrb[10].mxu1 }
 0x4e9   : > { %v1147_v46 = vpop.f32.mrb[11].mxu1 }
 0x550   : > { %v742_v49 = vpop.f32.mrb[12].mxu0 }
 0x551   : > { %845 = vrot.lane.b32.xlu0 %v742_v49, %s1525_s7  ;;  %v1152_v50 = vpop.f32.mrb[13].mxu0 }
 0x552   : > { %v745_v51 = vpop.f32.mrb[14].mxu0 }
 0x553   : > { %v1153_v52 = vpop.f32.mrb[15].mxu0  ;;  %v790_v53 = vpop.f32.mrb[12].mxu1 }
 0x554   : > { %849 = vrot.lane.b32.xlu1 %v790_v53, %s1526_s8  ;;  %v1158_v54 = vpop.f32.mrb[13].mxu1 }
 0x555   : > { %v793_v55 = vpop.f32.mrb[14].mxu1 }
 0x556   : > { %v1159_v56 = vpop.f32.mrb[15].mxu1 }
 0x558   : > { %v838_v57 = vpop.f32.mrb[16].mxu0 }
 0x559   : > { %853 = vrot.lane.b32.xlu0 %v838_v57, %s1527_s14  ;;  %v1164_v0 = vpop.f32.mrb[17].mxu0 }
 0x55a   : > { %v841_v58 = vpop.f32.mrb[18].mxu0 }
 0x55b   : > { %v1165_v59 = vpop.f32.mrb[19].mxu0 }
 0x5c3   : > { %v846_v60 = vpop.permute.xlu0 %845 }
 0x5c4   : > { %v856_v62 = vsel %vm395_vm2, %v694_v43, %v846_v60 }
 0x5c6   : > { %v850_v61 = vpop.permute.xlu1 %849 }
 0x5c7   : > { %v858_v63 = vsel %vm857_vm7, %v856_v62, %v850_v61 }
 0x5cb   : > { %v854_v1 = vpop.permute.xlu0 %853 }
 0x5cc   : > { %v860_v2 = vsel %vm859_vm8, %v858_v63, %v854_v1 }
 0x5cd   : > { %v861_v3 = vpack.c.bf16 %v860_v2, %v860_v2 }
 0x5cf   : > { %1171 = vmatmul.mubr.msk.bf16.vlgmr.msra.gmra.mrb[16].mxu1 %vm319_vm1, %v861_v3 }
 0x6a2   : > { %v922_v5 = vpop.f32.mrb[16].mxu1 }
 0x6a3   : > { %v923_v6 = vadd.f32 %v1080_v4, %v922_v5  ;;  %v1172_v7 = vpop.f32.mrb[17].mxu1 }
 0x6a4   : > { %v925_v8 = vpop.f32.mrb[18].mxu1 }
 0x6a5   : > { %v1173_v9 = vpop.f32.mrb[19].mxu1  ;;  %928 = vst.msk [vmem:[%s293_s22] sm:$0xff] %vm319_vm1, %v923_v6 }
 0x6a6   : > { %1448 = shalt.err (!%p1445_p0)
}
 0x6a7   : > { %s1449_s11 = scalar_lea.hbm %s1888_s13, 128  ;;  %s1453_s8 = scalar_lea.hbm %s1938_s5, 256 }
 0x6a8   : > { %p1450_p2 = scmp.ne.s32.totalorder %s1888_s13, %s1449_s11  ;;  %p1454_p10 = scmp.lt.u32.totalorder %s1888_s13, %s1938_s5 }
 0x6a9   : > { %p1455_p11 = scmp.lt.u32.totalorder %s1453_s8, %s1449_s11  ;;  %p1457_p6 = scmp.lt.u32.totalorder %s1449_s11, %s1888_s13 }
 0x6aa   : > { %p1451_p8 = pnand %p1450_p2, %p1958_p5 }
 0x6ab   : > { %p1456_p1 = por %p1455_p11, %p1454_p10 }
 0x6ac   : > { %p1452_p4 = pneg %p1451_p8 }
 0x6ad   : > { %p1458_p7 = por %p1457_p6, %p1456_p1 }
 0x6af   : > { %p1459_p9 = pnand %p1458_p7, %p1452_p4 }
 0x6b1   : > { %1462 = shalt.err (!%p1459_p9)
}
 0x6b2   : > { %1192 = dma.vmem_to_hbm [thread:$0]  (%p1958_p5), %s1890_s30, 128, %s1888_s13, %s930_s24  }
 0x6b3 PF: > { %s955_s17 = sand.u32 1, %s1497_s18   ;;  %p1959_p12 = scmp.ne.s32.totalorder %s1949_s12, 0 }
 0x6b4   : > { %p1960_p3 = scmp.ge.s32.totalorder %s1509_s21, 2  ;;  %s956_s22 = scalar_lea.sflag [#allocation4], %s955_s17 }
 0x6b6   : > { %p1212_p13 = pnand %p1960_p3, %p1959_p12 }
 0x6b8   : > { %1492 = dma.done.wait (!%p1212_p13), %s956_s22, 128  }
 0x6b9   : > { %1494 = vsyncadd (!%p1212_p13), %s956_s22, 4294967168  ;;  %p20_p0 = scmp.ge.s32.totalorder %s1700_s28, 4   ;;  %s1961_s18 = smov %s1501_s19 }
 0x6ba   : > { %s1962_s19 = smov %s1505_s20  ;;  %s1963_s20 = smov %s1711_s16 }
 0x6bb   : > { %s1964_s21 = smov %s1700_s28  ;;  %22 = sbr.rel (!%p20_p0) target bundleno = 7 (0x7), region = 101 }
 0x6c2   :  { %961 = vsyncpa [#allocation3], 1 }
 0x6c3   :  { %963 = vsyncpa [#allocation3 + $0x1], 1 }
 0x6c4   :  { %964 = vsyncpa [#allocation6], 1 }
 0x6c5   :  { %965 = vsyncpa [#allocation9], 1 }
 0x6c6   :  { %966 = vsyncpa [#allocation4], 1 }
 0x6c7   :  { %968 = vsyncpa [#allocation4 + $0x1], 1 }

</bundles_post_ra>
